<compile_context>
chip_gen: v7x
topology: tpu7x:2x2x1
jax: 0.10.0
libtpu: 0.0.40
codegen_flags: <defaults>
</compile_context>

<pallas_src>
import math

import jax
import jax.numpy as jnp
from jax.experimental import pallas as pl
from jax.experimental.pallas import tpu as pltpu


# ----------------------------- Pallas kernel -------------------------------

def _encoder_block_kernel(x_ref, bias_ref,
                          wq_ref, wk_ref, wv_ref, bq_ref, bk_ref, bv_ref,
                          wo_ref, bo_ref, g1_ref, be1_ref,
                          w1_ref, b1_ref, w2_ref, b2_ref, g2_ref, be2_ref,
                          o_ref):
    x = x_ref[0]                 # (S, D) f32
    mask_bias = bias_ref[0]      # (1, S) f32: 0 = valid key, -1e9 = padding
    S, D = x.shape
    H, _, dk = wq_ref.shape      # per-head weights: (H, D, dk)
    n_ff = w1_ref.shape[0]       # FFN chunks:        (nF, D, Fc)
    eps = 1e-6
    scale = 1.0 / math.sqrt(dk)

    def layer_norm(y, g, b):
        mean = jnp.mean(y, axis=-1, keepdims=True)
        var = jnp.mean((y - mean) ** 2, axis=-1, keepdims=True)
        # Reference semantics: gamma * (x - mean) / (std + eps) + beta,
        # std unbiased=False.  Exact reciprocal here (correctness review).
        return g * (y - mean) / (jnp.sqrt(var) + eps) + b

    # ---------------- attention sublayer (pre-LN + residual) ----------------
    xn = layer_norm(x, g1_ref[...], be1_ref[...])
    xn_bf = xn.astype(jnp.bfloat16)

    def head_body(h, acc):
        # Per-head Q/K/V projections: full-K (K=D) matmuls against (D, dk)
        # weight slabs selected by a dynamic *leading-dim* ref index — no
        # lane-strided slicing of a fused QKV activation.
        qh = (jnp.dot(xn_bf, wq_ref[h], preferred_element_type=jnp.float32)
              + bq_ref[h]).astype(jnp.bfloat16)                      # (S, dk)
        kh = (jnp.dot(xn_bf, wk_ref[h], preferred_element_type=jnp.float32)
              + bk_ref[h]).astype(jnp.bfloat16)
        vh = (jnp.dot(xn_bf, wv_ref[h], preferred_element_type=jnp.float32)
              + bv_ref[h]).astype(jnp.bfloat16)
        # QK^T without explicit transpose: contract last dim vs last dim.
        s = jax.lax.dot_general(
            qh, kh, (((1,), (1,)), ((), ())),
            preferred_element_type=jnp.float32) * scale              # (S, S)
        s = s + mask_bias                       # broadcast (1,S) over rows
        s = s - jnp.max(s, axis=-1, keepdims=True)
        p = jnp.exp(s)
        p = p * pl.reciprocal(jnp.sum(p, axis=-1, keepdims=True), approx=True)
        ctx = jnp.dot(p.astype(jnp.bfloat16), vh,
                      preferred_element_type=jnp.float32)            # (S, dk)
        # Accumulate this head's slice of the output projection directly into
        # a full-width (S, D) carry: no masked sub-128-lane context stores.
        return acc + jnp.dot(ctx.astype(jnp.bfloat16), wo_ref[h],
                             preferred_element_type=jnp.float32)

    attn_out = jax.lax.fori_loop(0, H, head_body,
                                 jnp.zeros((S, D), jnp.float32))
    x = x + attn_out + bo_ref[...]            # residual (dropout = identity)

    # ---------------- feed-forward sublayer (pre-LN + residual) -------------
    xn2 = layer_norm(x, g2_ref[...], be2_ref[...])
    xn2_bf = xn2.astype(jnp.bfloat16)
    c_gelu = math.sqrt(2.0 / math.pi)

    def ffn_body(i, acc):
        h1 = (jnp.dot(xn2_bf, w1_ref[i], preferred_element_type=jnp.float32)
              + b1_ref[i])                                           # (S, Fc)
        h1 = 0.5 * h1 * (1.0 + jnp.tanh(c_gelu * (h1 + 0.044715 * h1 ** 3)))
        return acc + jnp.dot(h1.astype(jnp.bfloat16), w2_ref[i],
                             preferred_element_type=jnp.float32)

    ff = jax.lax.fori_loop(0, n_ff, ffn_body, jnp.zeros((S, D), jnp.float32))
    x = x + ff + b2_ref[...]                  # residual (dropout = identity)

    o_ref[0] = x


# -------------------------- pallas_call wrapper -----------------------------

def _vmem_limit_bytes():
    """Physical-VMEM-aware limit: ~48 MiB on v7x, ~100 MiB on v5e/v6e."""
    mib = 1024 * 1024
    try:
        cap = int(pltpu.get_tpu_info().vmem_capacity_bytes)
    except Exception:
        cap = 64 * mib
    return max(32 * mib, min(cap - 16 * mib, 100 * mib))


def encoder_block(x, mask_bias, ops, *, vmem_limit):
    """One BERT encoder block. x: (B,S,D) f32, mask_bias: (B,1,S) f32."""
    B, S, D = x.shape

    def const_spec(a):
        nd = a.ndim
        # Constant index map + single buffering: weights are grid-invariant,
        # so double-buffering them only doubles VMEM residency.
        return pl.BlockSpec(a.shape, lambda b, n=nd: (0,) * n,
                            pipeline_mode=pl.Buffered(1))

    in_specs = [
        pl.BlockSpec((1, S, D), lambda b: (b, 0, 0)),   # x
        pl.BlockSpec((1, 1, S), lambda b: (b, 0, 0)),   # additive mask bias
    ] + [const_spec(a) for a in ops]

    out_specs = pl.BlockSpec((1, S, D), lambda b: (b, 0, 0))

    return pl.pallas_call(
        _encoder_block_kernel,
        out_shape=jax.ShapeDtypeStruct((B, S, D), jnp.float32),
        grid_spec=pltpu.PrefetchScalarGridSpec(
            num_scalar_prefetch=0,
            grid=(B,),
            in_specs=in_specs,
            out_specs=out_specs,
        ),
        compiler_params=pltpu.CompilerParams(
            dimension_semantics=("parallel",),
            vmem_limit_bytes=vmem_limit),
    )(x, mask_bias, *ops)


# ----------------------------- parameter setup ------------------------------

def init_bert_params(key, vocab_size, hidden, n_layers, heads, d_ff, max_len):
    keys = jax.random.split(key, 4 + n_layers)
    std = 0.02
    params = {
        "token_emb": jax.random.normal(keys[0], (vocab_size, hidden), jnp.float32) * std,
        "pos_emb":   jax.random.normal(keys[1], (1, max_len, hidden), jnp.float32) * std,
        "seg_emb":   jax.random.normal(keys[2], (2, hidden), jnp.float32) * std,
        "layers":    [],
    }
    for li in range(n_layers):
        lk = jax.random.split(keys[4 + li], 8)
        D, F = hidden, d_ff
        layer = [
            jax.random.normal(lk[0], (D, D), jnp.float32) * std,  # Wq
            jnp.zeros((1, D), jnp.float32),                       # bq
            jax.random.normal(lk[1], (D, D), jnp.float32) * std,  # Wk
            jnp.zeros((1, D), jnp.float32),                       # bk
            jax.random.normal(lk[2], (D, D), jnp.float32) * std,  # Wv
            jnp.zeros((1, D), jnp.float32),                       # bv
            jax.random.normal(lk[3], (D, D), jnp.float32) * std,  # Wo
            jnp.zeros((1, D), jnp.float32),                       # bo
            jnp.ones((1, D), jnp.float32),                        # gamma (LN1)
            jnp.zeros((1, D), jnp.float32),                       # beta  (LN1)
            jax.random.normal(lk[4], (D, F), jnp.float32) * std,  # W1
            jnp.zeros((1, F), jnp.float32),                       # b1
            jax.random.normal(lk[5], (F, D), jnp.float32) * std,  # W2
            jnp.zeros((1, D), jnp.float32),                       # b2
            jnp.ones((1, D), jnp.float32),                        # gamma (LN2)
            jnp.zeros((1, D), jnp.float32),                       # beta  (LN2)
        ]
        params["layers"].append(layer)
    return params


def _ff_chunk_size(d_ff, target=512):
    if d_ff <= target:
        return d_ff
    for c in range(target, 0, -1):
        if d_ff % c == 0:
            return c
    return d_ff


def prepare_layer_params(layer, heads, ff_chunk_target=512):
    """One-time host-side layout/cast of a layer's weights for the kernel."""
    (wq, bq, wk, bk, wv, bv, wo, bo,
     g1, be1, w1, b1, w2, b2, g2, be2) = layer
    D = wq.shape[0]
    dk = D // heads
    F = w1.shape[1]
    fc = _ff_chunk_size(F, ff_chunk_target)
    nf = F // fc

    def head_weight(w):   # (D, D) -> (H, D, dk) bf16
        return jnp.transpose(w.reshape(D, heads, dk), (1, 0, 2)).astype(jnp.bfloat16)

    def head_bias(b):     # (1, D) -> (H, 1, dk) f32
        return jnp.transpose(b.reshape(1, heads, dk), (1, 0, 2)).astype(jnp.float32)

    ops = (
        head_weight(wq), head_weight(wk), head_weight(wv),
        head_bias(bq), head_bias(bk), head_bias(bv),
        wo.reshape(heads, dk, D).astype(jnp.bfloat16),                      # (H, dk, D)
        bo.astype(jnp.float32),                                             # (1, D)
        g1.astype(jnp.float32), be1.astype(jnp.float32),
        jnp.transpose(w1.reshape(D, nf, fc), (1, 0, 2)).astype(jnp.bfloat16),  # (nF, D, Fc)
        jnp.transpose(b1.reshape(1, nf, fc), (1, 0, 2)).astype(jnp.float32),   # (nF, 1, Fc)
        w2.reshape(nf, fc, D).astype(jnp.bfloat16),                         # (nF, Fc, D)
        b2.astype(jnp.float32),                                             # (1, D)
        g2.astype(jnp.float32), be2.astype(jnp.float32),
    )
    return ops


def prepare_bert_params(params, heads, ff_chunk_target=512):
    out = dict(params)
    out["layers"] = [prepare_layer_params(l, heads, ff_chunk_target)
                     for l in params["layers"]]
    return out


def bert_forward(prepared_params, tokens, segment_info):
    B, S = tokens.shape
    D = prepared_params["token_emb"].shape[1]

    # masked_fill(mask == 0, -1e9) expressed as a precomputed additive bias.
    mask_bias = jnp.where(tokens != 0, 0.0, -1e9).astype(jnp.float32).reshape(B, 1, S)

    # Input embedding (gathers; glue in plain JAX).
    x = (prepared_params["token_emb"][tokens] * math.sqrt(D)
         + prepared_params["pos_emb"][:, :S, :]
         + prepared_params["seg_emb"][segment_info]).astype(jnp.float32)

    vmem_limit = _vmem_limit_bytes()
    for ops in prepared_params["layers"]:
        x = encoder_block(x, mask_bias, ops, vmem_limit=vmem_limit)
    return x


# ------------------------------- demo / test --------------------------------

if __name__ == "__main__":
    VOCAB = 50
    HIDDEN = 32
    N_LAYERS = 2
    HEADS = 4
    D_FF = HIDDEN * 4
    B, S = 2, 8
    MAX_LEN = 16

    key = jax.random.PRNGKey(0)
    pkey, tkey, skey = jax.random.split(key, 3)

    raw_params = init_bert_params(pkey, VOCAB, HIDDEN, N_LAYERS, HEADS, D_FF, MAX_LEN)
    params = prepare_bert_params(raw_params, HEADS)   # one-time weight prep

    tokens = jax.random.randint(tkey, (B, S), 1, VOCAB, dtype=jnp.int32)
    tokens = tokens.at[0, S - 1].set(0)  # one padding token to exercise the mask
    segment_info = jax.random.randint(skey, (B, S), 0, 2, dtype=jnp.int32)

    out = bert_forward(params, tokens, segment_info)
    out = jax.block_until_ready(out)

    assert out.shape == (B, S, HIDDEN)
    assert bool(jnp.all(jnp.isfinite(out)))
    print("KERNEL_OK")
</pallas_src>

<mosaic_0001>
module attributes {stable_mosaic.version = 11 : i64} {
  func.func @_encoder_block_kernel(%arg0: i32, %arg1: memref<1x8x32xf32, #tpu.memory_space<vmem>>, %arg2: memref<1x1x8xf32, #tpu.memory_space<vmem>>, %arg3: memref<4x32x8xbf16, #tpu.memory_space<vmem>>, %arg4: memref<4x32x8xbf16, #tpu.memory_space<vmem>>, %arg5: memref<4x32x8xbf16, #tpu.memory_space<vmem>>, %arg6: memref<4x1x8xf32, #tpu.memory_space<vmem>>, %arg7: memref<4x1x8xf32, #tpu.memory_space<vmem>>, %arg8: memref<4x1x8xf32, #tpu.memory_space<vmem>>, %arg9: memref<4x8x32xbf16, #tpu.memory_space<vmem>>, %arg10: memref<1x32xf32, #tpu.memory_space<vmem>>, %arg11: memref<1x32xf32, #tpu.memory_space<vmem>>, %arg12: memref<1x32xf32, #tpu.memory_space<vmem>>, %arg13: memref<1x32x128xbf16, #tpu.memory_space<vmem>>, %arg14: memref<1x1x128xf32, #tpu.memory_space<vmem>>, %arg15: memref<1x128x32xbf16, #tpu.memory_space<vmem>>, %arg16: memref<1x32xf32, #tpu.memory_space<vmem>>, %arg17: memref<1x32xf32, #tpu.memory_space<vmem>>, %arg18: memref<1x32xf32, #tpu.memory_space<vmem>>, %arg19: memref<1x8x32xf32, #tpu.memory_space<vmem>>) attributes {dimension_semantics = [#tpu.dimension_semantics<parallel>], iteration_bounds = array<i64: 2>, scalar_prefetch = 0 : i64, scratch_operands = 0 : i64, tpu.core_type = #tpu.core_type<tc>, window_params = [{transform_indices = @transform_0, window_bounds = array<i64: 1, 8, 32>}, {transform_indices = @transform_1, window_bounds = array<i64: 1, 1, 8>}, {pipeline_mode = #tpu.pipeline_mode<synchronous>, transform_indices = @transform_2, window_bounds = array<i64: 4, 32, 8>}, {pipeline_mode = #tpu.pipeline_mode<synchronous>, transform_indices = @transform_3, window_bounds = array<i64: 4, 32, 8>}, {pipeline_mode = #tpu.pipeline_mode<synchronous>, transform_indices = @transform_4, window_bounds = array<i64: 4, 32, 8>}, {pipeline_mode = #tpu.pipeline_mode<synchronous>, transform_indices = @transform_5, window_bounds = array<i64: 4, 1, 8>}, {pipeline_mode = #tpu.pipeline_mode<synchronous>, transform_indices = @transform_6, window_bounds = array<i64: 4, 1, 8>}, {pipeline_mode = #tpu.pipeline_mode<synchronous>, transform_indices = @transform_7, window_bounds = array<i64: 4, 1, 8>}, {pipeline_mode = #tpu.pipeline_mode<synchronous>, transform_indices = @transform_8, window_bounds = array<i64: 4, 8, 32>}, {pipeline_mode = #tpu.pipeline_mode<synchronous>, transform_indices = @transform_9, window_bounds = array<i64: 1, 32>}, {pipeline_mode = #tpu.pipeline_mode<synchronous>, transform_indices = @transform_10, window_bounds = array<i64: 1, 32>}, {pipeline_mode = #tpu.pipeline_mode<synchronous>, transform_indices = @transform_11, window_bounds = array<i64: 1, 32>}, {pipeline_mode = #tpu.pipeline_mode<synchronous>, transform_indices = @transform_12, window_bounds = array<i64: 1, 32, 128>}, {pipeline_mode = #tpu.pipeline_mode<synchronous>, transform_indices = @transform_13, window_bounds = array<i64: 1, 1, 128>}, {pipeline_mode = #tpu.pipeline_mode<synchronous>, transform_indices = @transform_14, window_bounds = array<i64: 1, 128, 32>}, {pipeline_mode = #tpu.pipeline_mode<synchronous>, transform_indices = @transform_15, window_bounds = array<i64: 1, 32>}, {pipeline_mode = #tpu.pipeline_mode<synchronous>, transform_indices = @transform_16, window_bounds = array<i64: 1, 32>}, {pipeline_mode = #tpu.pipeline_mode<synchronous>, transform_indices = @transform_17, window_bounds = array<i64: 1, 32>}, {transform_indices = @transform_18, window_bounds = array<i64: 1, 8, 32>}]} {
    %c0 = arith.constant 0 : index
    %c0_0 = arith.constant 0 : index
    %c0_1 = arith.constant 0 : index
    %0 = vector.load %arg1[%c0, %c0_0, %c0_1] : memref<1x8x32xf32, #tpu.memory_space<vmem>>, vector<1x8x32xf32>
    %1 = vector.shape_cast %0 : vector<1x8x32xf32> to vector<8x32xf32>
    %c0_2 = arith.constant 0 : index
    %c0_3 = arith.constant 0 : index
    %c0_4 = arith.constant 0 : index
    %2 = vector.load %arg2[%c0_2, %c0_3, %c0_4] : memref<1x1x8xf32, #tpu.memory_space<vmem>>, vector<1x1x8xf32>
    %3 = vector.shape_cast %2 : vector<1x1x8xf32> to vector<1x8xf32>
    %c0_5 = arith.constant 0 : index
    %c0_6 = arith.constant 0 : index
    %4 = vector.load %arg11[%c0_5, %c0_6] : memref<1x32xf32, #tpu.memory_space<vmem>>, vector<1x32xf32>
    %c0_7 = arith.constant 0 : index
    %c0_8 = arith.constant 0 : index
    %5 = vector.load %arg12[%c0_7, %c0_8] : memref<1x32xf32, #tpu.memory_space<vmem>>, vector<1x32xf32>
    %cst = arith.constant dense<0.000000e+00> : vector<8xf32>
    %6 = vector.multi_reduction <add>, %1, %cst [1] : vector<8x32xf32> to vector<8xf32>
    %7 = vector.shape_cast %6 : vector<8xf32> to vector<8x1xf32>
    %cst_9 = arith.constant 3.200000e+01 : f32
    %8 = vector.broadcast %cst_9 : f32 to vector<8x1xf32>
    %9 = arith.divf %7, %8 : vector<8x1xf32>
    %10 = vector.broadcast %9 : vector<8x1xf32> to vector<8x32xf32>
    %11 = arith.subf %1, %10 : vector<8x32xf32>
    %12 = arith.mulf %11, %11 : vector<8x32xf32>
    %cst_10 = arith.constant dense<0.000000e+00> : vector<8xf32>
    %13 = vector.multi_reduction <add>, %12, %cst_10 [1] : vector<8x32xf32> to vector<8xf32>
    %14 = vector.shape_cast %13 : vector<8xf32> to vector<8x1xf32>
    %cst_11 = arith.constant 3.200000e+01 : f32
    %15 = vector.broadcast %cst_11 : f32 to vector<8x1xf32>
    %16 = arith.divf %14, %15 : vector<8x1xf32>
    %17 = vector.broadcast %9 : vector<8x1xf32> to vector<8x32xf32>
    %18 = arith.subf %1, %17 : vector<8x32xf32>
    %19 = vector.broadcast %4 : vector<1x32xf32> to vector<8x32xf32>
    %20 = arith.mulf %19, %18 : vector<8x32xf32>
    %21 = math.sqrt %16 : vector<8x1xf32>
    %cst_12 = arith.constant 9.99999997E-7 : f32
    %22 = vector.broadcast %cst_12 : f32 to vector<8x1xf32>
    %23 = arith.addf %21, %22 : vector<8x1xf32>
    %24 = vector.broadcast %23 : vector<8x1xf32> to vector<8x32xf32>
    %25 = arith.divf %20, %24 : vector<8x32xf32>
    %26 = vector.broadcast %5 : vector<1x32xf32> to vector<8x32xf32>
    %27 = arith.addf %25, %26 : vector<8x32xf32>
    %28 = arith.truncf %27 : vector<8x32xf32> to vector<8x32xbf16>
    %cst_13 = arith.constant 0.000000e+00 : f32
    %29 = vector.broadcast %cst_13 : f32 to vector<8x32xf32>
    %c0_i32 = arith.constant 0 : i32
    %c4_i32 = arith.constant 4 : i32
    %30 = arith.addi %c0_i32, %c4_i32 : i32
    %c1_i32 = arith.constant 1 : i32
    %31 = scf.for %arg20 = %c0_i32 to %30 step %c1_i32 iter_args(%arg21 = %29) -> (vector<8x32xf32>)  : i32 {
      %97 = arith.index_cast %arg20 : i32 to index
      %c0_46 = arith.constant 0 : index
      %c0_47 = arith.constant 0 : index
      %98 = vector.load %arg3[%97, %c0_46, %c0_47] : memref<4x32x8xbf16, #tpu.memory_space<vmem>>, vector<1x32x8xbf16>
      %99 = vector.shape_cast %98 : vector<1x32x8xbf16> to vector<32x8xbf16>
      %cst_48 = arith.constant dense<0.000000e+00> : vector<8x8xf32>
      %100 = tpu.matmul %28, %99, %cst_48 {dimension_numbers = #tpu.dot_dimension_numbers<[1], [0], [0], [1], [0, 0, 1, 1], [], []>} : vector<8x32xbf16>, vector<32x8xbf16>, vector<8x8xf32> -> vector<8x8xf32>
      %101 = arith.index_cast %arg20 : i32 to index
      %c0_49 = arith.constant 0 : index
      %c0_50 = arith.constant 0 : index
      %102 = vector.load %arg6[%101, %c0_49, %c0_50] : memref<4x1x8xf32, #tpu.memory_space<vmem>>, vector<1x1x8xf32>
      %103 = vector.shape_cast %102 : vector<1x1x8xf32> to vector<1x8xf32>
      %104 = vector.broadcast %103 : vector<1x8xf32> to vector<8x8xf32>
      %105 = arith.addf %100, %104 : vector<8x8xf32>
      %106 = arith.truncf %105 : vector<8x8xf32> to vector<8x8xbf16>
      %107 = arith.index_cast %arg20 : i32 to index
      %c0_51 = arith.constant 0 : index
      %c0_52 = arith.constant 0 : index
      %108 = vector.load %arg4[%107, %c0_51, %c0_52] : memref<4x32x8xbf16, #tpu.memory_space<vmem>>, vector<1x32x8xbf16>
      %109 = vector.shape_cast %108 : vector<1x32x8xbf16> to vector<32x8xbf16>
      %cst_53 = arith.constant dense<0.000000e+00> : vector<8x8xf32>
      %110 = tpu.matmul %28, %109, %cst_53 {dimension_numbers = #tpu.dot_dimension_numbers<[1], [0], [0], [1], [0, 0, 1, 1], [], []>} : vector<8x32xbf16>, vector<32x8xbf16>, vector<8x8xf32> -> vector<8x8xf32>
      %111 = arith.index_cast %arg20 : i32 to index
      %c0_54 = arith.constant 0 : index
      %c0_55 = arith.constant 0 : index
      %112 = vector.load %arg7[%111, %c0_54, %c0_55] : memref<4x1x8xf32, #tpu.memory_space<vmem>>, vector<1x1x8xf32>
      %113 = vector.shape_cast %112 : vector<1x1x8xf32> to vector<1x8xf32>
      %114 = vector.broadcast %113 : vector<1x8xf32> to vector<8x8xf32>
      %115 = arith.addf %110, %114 : vector<8x8xf32>
      %116 = arith.truncf %115 : vector<8x8xf32> to vector<8x8xbf16>
      %117 = arith.index_cast %arg20 : i32 to index
      %c0_56 = arith.constant 0 : index
      %c0_57 = arith.constant 0 : index
      %118 = vector.load %arg5[%117, %c0_56, %c0_57] : memref<4x32x8xbf16, #tpu.memory_space<vmem>>, vector<1x32x8xbf16>
      %119 = vector.shape_cast %118 : vector<1x32x8xbf16> to vector<32x8xbf16>
      %cst_58 = arith.constant dense<0.000000e+00> : vector<8x8xf32>
      %120 = tpu.matmul %28, %119, %cst_58 {dimension_numbers = #tpu.dot_dimension_numbers<[1], [0], [0], [1], [0, 0, 1, 1], [], []>} : vector<8x32xbf16>, vector<32x8xbf16>, vector<8x8xf32> -> vector<8x8xf32>
      %121 = arith.index_cast %arg20 : i32 to index
      %c0_59 = arith.constant 0 : index
      %c0_60 = arith.constant 0 : index
      %122 = vector.load %arg8[%121, %c0_59, %c0_60] : memref<4x1x8xf32, #tpu.memory_space<vmem>>, vector<1x1x8xf32>
      %123 = vector.shape_cast %122 : vector<1x1x8xf32> to vector<1x8xf32>
      %124 = vector.broadcast %123 : vector<1x8xf32> to vector<8x8xf32>
      %125 = arith.addf %120, %124 : vector<8x8xf32>
      %126 = arith.truncf %125 : vector<8x8xf32> to vector<8x8xbf16>
      %cst_61 = arith.constant dense<0.000000e+00> : vector<8x8xf32>
      %127 = tpu.matmul %106, %116, %cst_61 {dimension_numbers = #tpu.dot_dimension_numbers<[1], [1], [0], [0], [0, 0, 1, 0], [], []>} : vector<8x8xbf16>, vector<8x8xbf16>, vector<8x8xf32> -> vector<8x8xf32>
      %cst_62 = arith.constant 0.353553385 : f32
      %128 = vector.broadcast %cst_62 : f32 to vector<8x8xf32>
      %129 = arith.mulf %127, %128 : vector<8x8xf32>
      %130 = vector.broadcast %3 : vector<1x8xf32> to vector<8x8xf32>
      %131 = arith.addf %129, %130 : vector<8x8xf32>
      %cst_63 = arith.constant dense<0xFF800000> : vector<8xf32>
      %132 = vector.multi_reduction <maximumf>, %131, %cst_63 [1] : vector<8x8xf32> to vector<8xf32>
      %133 = vector.shape_cast %132 : vector<8xf32> to vector<8x1xf32>
      %134 = vector.broadcast %133 : vector<8x1xf32> to vector<8x8xf32>
      %135 = arith.subf %131, %134 : vector<8x8xf32>
      %136 = math.exp %135 : vector<8x8xf32>
      %cst_64 = arith.constant dense<0.000000e+00> : vector<8xf32>
      %137 = vector.multi_reduction <add>, %136, %cst_64 [1] : vector<8x8xf32> to vector<8xf32>
      %138 = vector.shape_cast %137 : vector<8xf32> to vector<8x1xf32>
      %139 = tpu.reciprocal %138 {approx = true} : vector<8x1xf32> -> vector<8x1xf32>
      %140 = vector.broadcast %139 : vector<8x1xf32> to vector<8x8xf32>
      %141 = arith.mulf %136, %140 : vector<8x8xf32>
      %142 = arith.truncf %141 : vector<8x8xf32> to vector<8x8xbf16>
      %cst_65 = arith.constant dense<0.000000e+00> : vector<8x8xf32>
      %143 = tpu.matmul %142, %126, %cst_65 {dimension_numbers = #tpu.dot_dimension_numbers<[1], [0], [0], [1], [0, 0, 1, 1], [], []>} : vector<8x8xbf16>, vector<8x8xbf16>, vector<8x8xf32> -> vector<8x8xf32>
      %144 = arith.truncf %143 : vector<8x8xf32> to vector<8x8xbf16>
      %145 = arith.index_cast %arg20 : i32 to index
      %c0_66 = arith.constant 0 : index
      %c0_67 = arith.constant 0 : index
      %146 = vector.load %arg9[%145, %c0_66, %c0_67] : memref<4x8x32xbf16, #tpu.memory_space<vmem>>, vector<1x8x32xbf16>
      %147 = vector.shape_cast %146 : vector<1x8x32xbf16> to vector<8x32xbf16>
      %cst_68 = arith.constant dense<0.000000e+00> : vector<8x32xf32>
      %148 = tpu.matmul %144, %147, %cst_68 {dimension_numbers = #tpu.dot_dimension_numbers<[1], [0], [0], [1], [0, 0, 1, 1], [], []>} : vector<8x8xbf16>, vector<8x32xbf16>, vector<8x32xf32> -> vector<8x32xf32>
      %149 = arith.addf %arg21, %148 : vector<8x32xf32>
      scf.yield %149 : vector<8x32xf32>
    }
    %c4_i32_14 = arith.constant 4 : i32
    %32 = arith.addf %1, %31 : vector<8x32xf32>
    %c0_15 = arith.constant 0 : index
    %c0_16 = arith.constant 0 : index
    %33 = vector.load %arg10[%c0_15, %c0_16] : memref<1x32xf32, #tpu.memory_space<vmem>>, vector<1x32xf32>
    %34 = vector.broadcast %33 : vector<1x32xf32> to vector<8x32xf32>
    %35 = arith.addf %32, %34 : vector<8x32xf32>
    %c0_17 = arith.constant 0 : index
    %c0_18 = arith.constant 0 : index
    %36 = vector.load %arg17[%c0_17, %c0_18] : memref<1x32xf32, #tpu.memory_space<vmem>>, vector<1x32xf32>
    %c0_19 = arith.constant 0 : index
    %c0_20 = arith.constant 0 : index
    %37 = vector.load %arg18[%c0_19, %c0_20] : memref<1x32xf32, #tpu.memory_space<vmem>>, vector<1x32xf32>
    %cst_21 = arith.constant dense<0.000000e+00> : vector<8xf32>
    %38 = vector.multi_reduction <add>, %35, %cst_21 [1] : vector<8x32xf32> to vector<8xf32>
    %39 = vector.shape_cast %38 : vector<8xf32> to vector<8x1xf32>
    %cst_22 = arith.constant 3.200000e+01 : f32
    %40 = vector.broadcast %cst_22 : f32 to vector<8x1xf32>
    %41 = arith.divf %39, %40 : vector<8x1xf32>
    %42 = vector.broadcast %41 : vector<8x1xf32> to vector<8x32xf32>
    %43 = arith.subf %35, %42 : vector<8x32xf32>
    %44 = arith.mulf %43, %43 : vector<8x32xf32>
    %cst_23 = arith.constant dense<0.000000e+00> : vector<8xf32>
    %45 = vector.multi_reduction <add>, %44, %cst_23 [1] : vector<8x32xf32> to vector<8xf32>
    %46 = vector.shape_cast %45 : vector<8xf32> to vector<8x1xf32>
    %cst_24 = arith.constant 3.200000e+01 : f32
    %47 = vector.broadcast %cst_24 : f32 to vector<8x1xf32>
    %48 = arith.divf %46, %47 : vector<8x1xf32>
    %49 = vector.broadcast %41 : vector<8x1xf32> to vector<8x32xf32>
    %50 = arith.subf %35, %49 : vector<8x32xf32>
    %51 = vector.broadcast %36 : vector<1x32xf32> to vector<8x32xf32>
    %52 = arith.mulf %51, %50 : vector<8x32xf32>
    %53 = math.sqrt %48 : vector<8x1xf32>
    %cst_25 = arith.constant 9.99999997E-7 : f32
    %54 = vector.broadcast %cst_25 : f32 to vector<8x1xf32>
    %55 = arith.addf %53, %54 : vector<8x1xf32>
    %56 = vector.broadcast %55 : vector<8x1xf32> to vector<8x32xf32>
    %57 = arith.divf %52, %56 : vector<8x32xf32>
    %58 = vector.broadcast %37 : vector<1x32xf32> to vector<8x32xf32>
    %59 = arith.addf %57, %58 : vector<8x32xf32>
    %60 = arith.truncf %59 : vector<8x32xf32> to vector<8x32xbf16>
    %cst_26 = arith.constant 0.000000e+00 : f32
    %61 = vector.broadcast %cst_26 : f32 to vector<8x32xf32>
    %c0_i32_27 = arith.constant 0 : i32
    %62 = arith.index_cast %c0_i32_27 : i32 to index
    %c0_28 = arith.constant 0 : index
    %c0_29 = arith.constant 0 : index
    %63 = vector.load %arg13[%62, %c0_28, %c0_29] : memref<1x32x128xbf16, #tpu.memory_space<vmem>>, vector<1x32x128xbf16>
    %64 = vector.shape_cast %63 : vector<1x32x128xbf16> to vector<32x128xbf16>
    %cst_30 = arith.constant dense<0.000000e+00> : vector<8x128xf32>
    %65 = tpu.matmul %60, %64, %cst_30 {dimension_numbers = #tpu.dot_dimension_numbers<[1], [0], [0], [1], [0, 0, 1, 1], [], []>} : vector<8x32xbf16>, vector<32x128xbf16>, vector<8x128xf32> -> vector<8x128xf32>
    %66 = arith.index_cast %c0_i32_27 : i32 to index
    %c0_31 = arith.constant 0 : index
    %c0_32 = arith.constant 0 : index
    %67 = vector.load %arg14[%66, %c0_31, %c0_32] : memref<1x1x128xf32, #tpu.memory_space<vmem>>, vector<1x1x128xf32>
    %68 = vector.shape_cast %67 : vector<1x1x128xf32> to vector<1x128xf32>
    %69 = vector.broadcast %68 : vector<1x128xf32> to vector<8x128xf32>
    %70 = arith.addf %65, %69 : vector<8x128xf32>
    %cst_33 = arith.constant 5.000000e-01 : f32
    %71 = vector.broadcast %cst_33 : f32 to vector<8x128xf32>
    %72 = arith.mulf %71, %70 : vector<8x128xf32>
    %73 = arith.mulf %70, %70 : vector<8x128xf32>
    %74 = arith.mulf %70, %73 : vector<8x128xf32>
    %cst_34 = arith.constant 4.471500e-02 : f32
    %75 = vector.broadcast %cst_34 : f32 to vector<8x128xf32>
    %76 = arith.mulf %75, %74 : vector<8x128xf32>
    %77 = arith.addf %70, %76 : vector<8x128xf32>
    %cst_35 = arith.constant 0.797884583 : f32
    %78 = vector.broadcast %cst_35 : f32 to vector<8x128xf32>
    %79 = arith.mulf %78, %77 : vector<8x128xf32>
    %80 = math.tanh %79 : vector<8x128xf32>
    %cst_36 = arith.constant 1.000000e+00 : f32
    %81 = vector.broadcast %cst_36 : f32 to vector<8x128xf32>
    %82 = arith.addf %81, %80 : vector<8x128xf32>
    %83 = arith.mulf %72, %82 : vector<8x128xf32>
    %84 = arith.truncf %83 : vector<8x128xf32> to vector<8x128xbf16>
    %85 = arith.index_cast %c0_i32_27 : i32 to index
    %c0_37 = arith.constant 0 : index
    %c0_38 = arith.constant 0 : index
    %86 = vector.load %arg15[%85, %c0_37, %c0_38] : memref<1x128x32xbf16, #tpu.memory_space<vmem>>, vector<1x128x32xbf16>
    %87 = vector.shape_cast %86 : vector<1x128x32xbf16> to vector<128x32xbf16>
    %cst_39 = arith.constant dense<0.000000e+00> : vector<8x32xf32>
    %88 = tpu.matmul %84, %87, %cst_39 {dimension_numbers = #tpu.dot_dimension_numbers<[1], [0], [0], [1], [0, 0, 1, 1], [], []>} : vector<8x128xbf16>, vector<128x32xbf16>, vector<8x32xf32> -> vector<8x32xf32>
    %89 = arith.addf %61, %88 : vector<8x32xf32>
    %c1_i32_40 = arith.constant 1 : i32
    %90 = arith.addf %35, %89 : vector<8x32xf32>
    %c0_41 = arith.constant 0 : index
    %c0_42 = arith.constant 0 : index
    %91 = vector.load %arg16[%c0_41, %c0_42] : memref<1x32xf32, #tpu.memory_space<vmem>>, vector<1x32xf32>
    %92 = vector.broadcast %91 : vector<1x32xf32> to vector<8x32xf32>
    %93 = arith.addf %90, %92 : vector<8x32xf32>
    %c0_43 = arith.constant 0 : index
    %c0_44 = arith.constant 0 : index
    %c0_45 = arith.constant 0 : index
    %94 = vector.load %arg19[%c0_43, %c0_44, %c0_45] : memref<1x8x32xf32, #tpu.memory_space<vmem>>, vector<1x8x32xf32>
    %95 = vector.shape_cast %94 : vector<1x8x32xf32> to vector<8x32xf32>
    %96 = vector.shape_cast %93 : vector<8x32xf32> to vector<1x8x32xf32>
    tpu.vector_store %arg19[%c0_43, %c0_44, %c0_45], %96 {strides = array<i32>} : memref<1x8x32xf32, #tpu.memory_space<vmem>>, vector<1x8x32xf32>,
    return
  }
  func.func @transform_0(%arg0: i32) -> (i32, i32, i32) {
    %c0_i32 = arith.constant 0 : i32
    %c0_i32_0 = arith.constant 0 : i32
    %c0_i32_1 = arith.constant 0 : i32
    return %arg0, %c0_i32, %c0_i32_0 : i32, i32, i32
  }
  func.func @transform_1(%arg0: i32) -> (i32, i32, i32) {
    %c0_i32 = arith.constant 0 : i32
    %c0_i32_0 = arith.constant 0 : i32
    %c0_i32_1 = arith.constant 0 : i32
    return %arg0, %c0_i32, %c0_i32_0 : i32, i32, i32
  }
  func.func @transform_2(%arg0: i32) -> (i32, i32, i32) {
    %c0_i32 = arith.constant 0 : i32
    %c0_i32_0 = arith.constant 0 : i32
    %c0_i32_1 = arith.constant 0 : i32
    %c0_i32_2 = arith.constant 0 : i32
    return %c0_i32, %c0_i32_0, %c0_i32_1 : i32, i32, i32
  }
  func.func @transform_3(%arg0: i32) -> (i32, i32, i32) {
    %c0_i32 = arith.constant 0 : i32
    %c0_i32_0 = arith.constant 0 : i32
    %c0_i32_1 = arith.constant 0 : i32
    %c0_i32_2 = arith.constant 0 : i32
    return %c0_i32, %c0_i32_0, %c0_i32_1 : i32, i32, i32
  }
  func.func @transform_4(%arg0: i32) -> (i32, i32, i32) {
    %c0_i32 = arith.constant 0 : i32
    %c0_i32_0 = arith.constant 0 : i32
    %c0_i32_1 = arith.constant 0 : i32
    %c0_i32_2 = arith.constant 0 : i32
    return %c0_i32, %c0_i32_0, %c0_i32_1 : i32, i32, i32
  }
  func.func @transform_5(%arg0: i32) -> (i32, i32, i32) {
    %c0_i32 = arith.constant 0 : i32
    %c0_i32_0 = arith.constant 0 : i32
    %c0_i32_1 = arith.constant 0 : i32
    %c0_i32_2 = arith.constant 0 : i32
    return %c0_i32, %c0_i32_0, %c0_i32_1 : i32, i32, i32
  }
  func.func @transform_6(%arg0: i32) -> (i32, i32, i32) {
    %c0_i32 = arith.constant 0 : i32
    %c0_i32_0 = arith.constant 0 : i32
    %c0_i32_1 = arith.constant 0 : i32
    %c0_i32_2 = arith.constant 0 : i32
    return %c0_i32, %c0_i32_0, %c0_i32_1 : i32, i32, i32
  }
  func.func @transform_7(%arg0: i32) -> (i32, i32, i32) {
    %c0_i32 = arith.constant 0 : i32
    %c0_i32_0 = arith.constant 0 : i32
    %c0_i32_1 = arith.constant 0 : i32
    %c0_i32_2 = arith.constant 0 : i32
    return %c0_i32, %c0_i32_0, %c0_i32_1 : i32, i32, i32
  }
  func.func @transform_8(%arg0: i32) -> (i32, i32, i32) {
    %c0_i32 = arith.constant 0 : i32
    %c0_i32_0 = arith.constant 0 : i32
    %c0_i32_1 = arith.constant 0 : i32
    %c0_i32_2 = arith.constant 0 : i32
    return %c0_i32, %c0_i32_0, %c0_i32_1 : i32, i32, i32
  }
  func.func @transform_9(%arg0: i32) -> (i32, i32) {
    %c0_i32 = arith.constant 0 : i32
    %c0_i32_0 = arith.constant 0 : i32
    %c0_i32_1 = arith.constant 0 : i32
    return %c0_i32, %c0_i32_0 : i32, i32
  }
  func.func @transform_10(%arg0: i32) -> (i32, i32) {
    %c0_i32 = arith.constant 0 : i32
    %c0_i32_0 = arith.constant 0 : i32
    %c0_i32_1 = arith.constant 0 : i32
    return %c0_i32, %c0_i32_0 : i32, i32
  }
  func.func @transform_11(%arg0: i32) -> (i32, i32) {
    %c0_i32 = arith.constant 0 : i32
    %c0_i32_0 = arith.constant 0 : i32
    %c0_i32_1 = arith.constant 0 : i32
    return %c0_i32, %c0_i32_0 : i32, i32
  }
  func.func @transform_12(%arg0: i32) -> (i32, i32, i32) {
    %c0_i32 = arith.constant 0 : i32
    %c0_i32_0 = arith.constant 0 : i32
    %c0_i32_1 = arith.constant 0 : i32
    %c0_i32_2 = arith.constant 0 : i32
    return %c0_i32, %c0_i32_0, %c0_i32_1 : i32, i32, i32
  }
  func.func @transform_13(%arg0: i32) -> (i32, i32, i32) {
    %c0_i32 = arith.constant 0 : i32
    %c0_i32_0 = arith.constant 0 : i32
    %c0_i32_1 = arith.constant 0 : i32
    %c0_i32_2 = arith.constant 0 : i32
    return %c0_i32, %c0_i32_0, %c0_i32_1 : i32, i32, i32
  }
  func.func @transform_14(%arg0: i32) -> (i32, i32, i32) {
    %c0_i32 = arith.constant 0 : i32
    %c0_i32_0 = arith.constant 0 : i32
    %c0_i32_1 = arith.constant 0 : i32
    %c0_i32_2 = arith.constant 0 : i32
    return %c0_i32, %c0_i32_0, %c0_i32_1 : i32, i32, i32
  }
  func.func @transform_15(%arg0: i32) -> (i32, i32) {
    %c0_i32 = arith.constant 0 : i32
    %c0_i32_0 = arith.constant 0 : i32
    %c0_i32_1 = arith.constant 0 : i32
    return %c0_i32, %c0_i32_0 : i32, i32
  }
  func.func @transform_16(%arg0: i32) -> (i32, i32) {
    %c0_i32 = arith.constant 0 : i32
    %c0_i32_0 = arith.constant 0 : i32
    %c0_i32_1 = arith.constant 0 : i32
    return %c0_i32, %c0_i32_0 : i32, i32
  }
  func.func @transform_17(%arg0: i32) -> (i32, i32) {
    %c0_i32 = arith.constant 0 : i32
    %c0_i32_0 = arith.constant 0 : i32
    %c0_i32_1 = arith.constant 0 : i32
    return %c0_i32, %c0_i32_0 : i32, i32
  }
  func.func @transform_18(%arg0: i32) -> (i32, i32, i32) {
    %c0_i32 = arith.constant 0 : i32
    %c0_i32_0 = arith.constant 0 : i32
    %c0_i32_1 = arith.constant 0 : i32
    return %arg0, %c0_i32, %c0_i32_0 : i32, i32, i32
  }
}

</mosaic_0001>

<bundles_post_ra>
// kernel: tpu_custom_call.1
= control target key start
LH: loop header
LB: loop body
LE: loop exit
PB: predicated region body
PF: predicated region fallthrough
CT: control target
= control target key end

     0   :  { %s2009_s0 = inlined_call_operand.vmem [shape: f32[2,8,32], index: 0, kind: input, shape index: {}]   ;;  %s2010_s1 = inlined_call_operand.vmem [shape: f32[2,1,8], index: 1, kind: input, shape index: {}]   ;;  %s2011_s2 = inlined_call_operand.vmem [shape: bf16[4,32,8], index: 2, kind: input, shape index: {}]   ;;  %s2012_s3 = inlined_call_operand.vmem [shape: bf16[4,32,8], index: 3, kind: input, shape index: {}]   ;;  %s2013_s4 = inlined_call_operand.vmem [shape: bf16[4,32,8], index: 4, kind: input, shape index: {}]   ;;  %s2014_s5 = inlined_call_operand.vmem [shape: f32[4,1,8], index: 5, kind: input, shape index: {}]   ;;  %s2015_s6 = inlined_call_operand.vmem [shape: f32[4,1,8], index: 6, kind: input, shape index: {}]   ;;  %s2016_s7 = inlined_call_operand.vmem [shape: f32[4,1,8], index: 7, kind: input, shape index: {}]   ;;  %s2017_s8 = inlined_call_operand.vmem [shape: bf16[4,8,32], index: 8, kind: input, shape index: {}]   ;;  %s2018_s9 = inlined_call_operand.vmem [shape: f32[1,32], index: 9, kind: input, shape index: {}]   ;;  %s2019_s10 = inlined_call_operand.vmem [shape: f32[1,32], index: 10, kind: input, shape index: {}]   ;;  %s2020_s11 = inlined_call_operand.vmem [shape: f32[1,32], index: 11, kind: input, shape index: {}]   ;;  %s2021_s12 = inlined_call_operand.vmem [shape: bf16[1,32,128], index: 12, kind: input, shape index: {}]   ;;  %s2022_s13 = inlined_call_operand.vmem [shape: f32[1,1,128], index: 13, kind: input, shape index: {}]   ;;  %s2023_s14 = inlined_call_operand.vmem [shape: bf16[1,128,32], index: 14, kind: input, shape index: {}]   ;;  %s2024_s15 = inlined_call_operand.vmem [shape: f32[1,32], index: 15, kind: input, shape index: {}]   ;;  %s2025_s16 = inlined_call_operand.vmem [shape: f32[1,32], index: 16, kind: input, shape index: {}]   ;;  %s2026_s17 = inlined_call_operand.vmem [shape: f32[1,32], index: 17, kind: input, shape index: {}]   ;;  %s2027_s18 = inlined_call_operand.hbm [shape: f32[2,8,32], index: 18, kind: output, shape index: {}]  }
   0x1   :  { %2034 = sst [smem:[#allocation10_spill]] %s2009_s0 }
   0x2   :  { %2035 = sst [smem:[#allocation11_spill]] %s2010_s1 }
   0x3   :  { %2036 = sst [smem:[#allocation12_spill]] %s2011_s2 }
   0x4   :  { %2037 = sst [smem:[#allocation13_spill]] %s2019_s10 }
   0x5   :  { %2038 = sst [smem:[#allocation14_spill]] %s2020_s11 }
   0x6   :  { %23 = vsyncpa [#allocation3], 0 }
   0x7   :  { %25 = vsyncpa [#allocation3 + $0x1], 0  ;;  %s1759_s27 = smov 0   ;;  %s1761_s28 = smov 0  }
   0x8   :  { %s1763_s29 = smov 0   ;;  %s1765_s30 = smov 0  }
   0x9 LB: > { %2039 = sst [smem:[#allocation5_spill]] %s1637_s27  ;;  %s1780_s0 = sadd.s32 4294967295, %s1649_s30   ;;  %s1649_s30 = sphi %s1765_s30, %s2057_s30   ;;  %s1645_s29 = sphi %s1763_s29, %s2062_s29   ;;  %s1641_s28 = sphi %s1761_s28, %s2061_s28   ;;  %s1637_s27 = sphi %s1759_s27, %s2060_s27  }
   0xa   : > { %2040 = sst [smem:[#allocation6_spill]] %s1645_s29  ;;  %s1341_s19 = sadd.s32 4294967294, %s1649_s30  }
   0xb   : > { %s1784_s1 = sadd.s32 1, %s1649_s30   ;;  %s426_s20 = sadd.s32 1, %s1645_s29 }
   0xc   : > { %2041 = sst [smem:[#allocation7_spill]] %s1784_s1  ;;  %s423_s21 = ssub.s32 %s1649_s30, %s1784_s1 }
   0xd   : > { %p436_p0 = scmp.ne.s32.totalorder %s1645_s29, %s1641_s28  ;;  %p424_p1 = scmp.eq.s32.totalorder %s423_s21, 0 }
   0xe   : > { %p437_p2 = scmp.eq.s32.totalorder %s1780_s0, 1  ;;  %p442_p3 = scmp.ne.s32.totalorder %s1641_s28, %s1637_s27 }
   0xf   : > { %p443_p4 = scmp.eq.s32.totalorder %s1341_s19, 1  ;;  %p1344_p7 = scmp.ge.s32.totalorder %s1649_s30, 1 }
  0x10   : > { %s1795_s22 = scalar_select %p424_p1, %s1645_s29, %s426_s20  }
  0x11   : > { %p1797_p5 = por %p437_p2, %p436_p0  ;;  %p1801_p6 = por %p443_p4, %p442_p3 }
  0x12   : > { %2042 = sst [smem:[#allocation8_spill]] %s1795_s22  ;;  %p522_p8 = scmp.lt.s32.totalorder %s1649_s30, 3 }
  0x13   : > { %s2044_s23 = scalar_select %p1801_p6, 1, 0 }
  0x14   : > { %p523_p9 = pnand %p1344_p7, %p522_p8 }
  0x15   : > { %2045 = sst [smem:[#allocation9_spill]] %s2044_s23  ;;  %p578_p10 = scmp.lt.s32.totalorder (!%p523_p9), %s1780_s0, 1  ;;  %vm590_vm0 = vcmask (!%p523_p9), 261120   ;;  %v1837_v23 = vmov (!%p523_p9), 0.0  }
  0x16   : > { %526 = sbr.rel (%p523_p9) target bundleno = 2358 (0x936), region = 92  ;;  %s2046_s20 = sld [smem:[#allocation11_spill]] (!%p523_p9) }
  0x17   : > { %s2047_s1 = sld [smem:[#allocation10_spill]] (!%p523_p9)  ;;  %s2048_s10 = sld [smem:[#allocation13_spill]] (!%p523_p9) }
  0x18   : > { %s2049_s11 = sld [smem:[#allocation14_spill]] (!%p523_p9)  ;;  %s1839_s19 = smov (!%p523_p9), 0  }
  0x1d   : > { %s579_s24 = scalar_select %p578_p10, %s1780_s0, 1  ;;  %v1347_v16 = vld [vmem:[%s2048_s10] ss:$0 sm:$0xff] }
  0x1e   : > { %v1348_v19 = vld [vmem:[%s2049_s11] ss:$0 sm:$0xff] }
  0x1f   : > { %s1346_s25 = sshll.u32 %s579_s24, 3  ;;  %s584_s21 = scalar_lea.vmem %s2046_s20, %s579_s24 }
  0x20   : > { %s581_s23 = scalar_lea.vmem %s2047_s1, %s1346_s25  ;;  %v1815_v0 = vld [vmem:[%s584_s21] ss:$0 sm:$0xff]  ;;  %s2032_s24 = sand.u32 1, %s1641_s28  }
  0x21   : > { %v1817_v1 = vld [vmem:[%s581_s23] sm:$0xff]  ;;  %s1826_s29 = sshll.u32 %s2032_s24, 3 }
  0x22   : > { %v591_v2 = vsel %vm590_vm0, %v1817_v1, 0.0 }
  0x23   : > { %592 = vadd.xlane.f32.xlu0 %v591_v2 }
  0xb0   : > { %v593_v3 = vpop.xlane.xlu0 %592 }
  0xb1   : > { %v595_v4 = vmul.f32 0.03125, %v593_v3 }
  0xb3   : > { %v596_v5 = vsub.f32 %v1817_v1, %v595_v4 }
  0xb5   : > { %v597_v6 = vmul.f32 %v596_v5, %v596_v5  ;;  %v608_v17 = vmul.f32 %v1347_v16, %v596_v5 }
  0xb7   : > { %v598_v7 = vsel %vm590_vm0, %v597_v6, 0.0 }
  0xb8   : > { %599 = vadd.xlane.f32.xlu0 %v598_v7 }
 0x145   : > { %v600_v8 = vpop.xlane.xlu0 %599 }
 0x146   : > { %v601_v9 = vmul.f32 0.03125, %v600_v8 }
 0x148   : > { %1549 = vrsqrt.f32 %v601_v9  ;;  %vm611_vm1 = vcmp.eq.f32.partialorder %v601_v9, inf  ;;  %v614_v12 = vand.u32 2147483648, %v601_v9  ;;  %vm613_vm2 = vcmp.eq.f32.partialorder %v601_v9, 0.0 }
 0x152   : > { %v1550_v10 = vpop.eup %1549 }
 0x153   : > { %v610_v11 = vmul.f32 %v1550_v10, %v601_v9 }
 0x155   : > { %v612_v13 = vsel %vm611_vm1, %v601_v9, %v610_v11 }
 0x156   : > { %v615_v14 = vsel %vm613_vm2, %v614_v12, %v612_v13 }
 0x157   : > { %v616_v15 = vadd.f32 1e-06, %v615_v14 }
 0x159   : > { %1551 = vrcp.f32 %v616_v15 }
 0x163   : > { %v1552_v18 = vpop.eup %1551 }
 0x164   : > { %v618_v20 = vmul.f32 %v1552_v18, %v608_v17 }
 0x166   : > { %v625_v21 = vadd.f32 %v1348_v19, %v618_v20 }
 0x168   : > { %v1834_v22 = vpack.c.bf16 %v625_v21, %v625_v21 }
 0x169 LB: >> { %v1659_v24 = vmov 0.0   ;;  %s1390_s20 = sshll.u32 %s1657_s19, 4  ;;  %vm1660_vm3 = vmmov 0   ;;  %s2050_s24 = sld [smem:[#allocation12_spill]]  ;;  %vm839_vm4 = vcmask 64512   ;;  %vm909_vm5 = vcmask 1043456   ;;  %s1657_s19 = sphi %s1839_s19, %s632_s19   ;;  %v1653_v23 = vphi %v1837_v23, %v2051_v23  }
 0x16a   : >> { %1428 = vmatprep.subr.bf16.mxu1 %v1659_v24  ;;  %1420 = vmatprep.subr.bf16.mxu0 %v1659_v24  ;;  %s706_s22 = scalar_lea.vmem %s2012_s3, %s1390_s20  ;;  %s1859_s27 = scalar_lea.vmem %s2013_s4, %s1390_s20 }
 0x16b   : >> { %1432 = vmatprep.mubr.msk.bf16.mxu1 %vm1660_vm3, %v1659_v24  ;;  %1424 = vmatprep.mubr.msk.bf16.mxu0 %vm1660_vm3, %v1659_v24  ;;  %v1553_v25 = vld [vmem:[%s706_s22] sm:$0xff]   ;;  %v1554_v26 = vld [vmem:[%s706_s22 + $0x8] sm:$0xff]   ;;  %s641_s21 = scalar_lea.vmem %s2014_s5, %s1657_s19  ;;  %s778_s22 = scalar_lea.vmem %s2016_s7, %s1657_s19 }
 0x16c   : >> { %1429 = vmatpush3.bf16.msra.mxu1 %v1553_v25  ;;  %v1351_v34 = vld [vmem:[%s641_s21] ss:$0 sm:$0xff]  ;;  %v1558_v45 = vld [vmem:[%s1859_s27 + $0x8] sm:$0xff]   ;;  %s1368_s23 = sshll.u32 %s1657_s19, 2 }
 0x16d   : >> { %1430 = vmatprep.subr.bf16.mxu1 %v1659_v24  ;;  %v1557_v44 = vld [vmem:[%s1859_s27] sm:$0xff]   ;;  %s955_s11 = scalar_lea.vmem %s2017_s8, %s1368_s23 }
 0x16e   : >> { %v1361_v61 = vld [vmem:[%s778_s22] ss:$0 sm:$0xff] }
 0x16f   : >> { %s636_s26 = scalar_lea.vmem %s2050_s24, %s1390_s20  ;;  %s711_s24 = scalar_lea.vmem %s2015_s6, %s1657_s19  ;;  %v956_v4 = vld [vmem:[%s955_s11] sm:$0xf] }
 0x170   : >> { %v1555_v27 = vld [vmem:[%s636_s26] sm:$0xff]   ;;  %v1556_v28 = vld [vmem:[%s636_s26 + $0x8] sm:$0xff]   ;;  %1431 = vmatpush3.bf16.msra.mxu1 %v1554_v26  ;;  %v961_v5 = vsel %vm909_vm5, %v956_v4, 0  ;;  %s632_s19 = sadd.s32 1, %s1657_s19  }
 0x171   : >> { %1421 = vmatpush3.bf16.msra.mxu0 %v1555_v27  ;;  %1444 = vmatprep.subr.bf16.mxu1 %v1659_v24  ;;  %v1356_v29 = vld [vmem:[%s711_s24] ss:$0 sm:$0xff]  ;;  %p629_p11 = scmp.ge.s32.totalorder %s632_s19, 4  }
 0x172   : >> { %1422 = vmatprep.subr.bf16.mxu0 %v1659_v24  ;;  %v1370_v21 = vld [vmem:[%s2018_s9] ss:$0 sm:$0xff] (%p629_p11)  ;;  %vm1662_vm6 = vmmov (%p629_p11), 0   ;;  %s1387_s1 = sshll.u32 (%p629_p11), %s1780_s0, 7  ;;  %s2052_s22 = scalar_lea.vmem (%p629_p11), [#allocation2], %s1826_s29 }
 0x173   : >> { %1433 = vmatmul.mubr.msk.bf16.vlgmr.msra.gmra.mrb[0].mxu1 %vm590_vm0, %v1834_v22  ;;  %s1254_s23 = sshll.u32 (%p629_p11), %s2052_s22, 4  ;;  %s1962_s11 = scalar_lea.hbm (%p629_p11), %s2027_s18, %s1387_s1  ;;  %s1964_s23 = int_to_ptr.vmem [resolvable:$true] %s1254_s23 }
 0x174   : >> { %1446 = vmatprep.mubr.msk.bf16.mxu1 %vm1660_vm3, %v1659_v24  ;;  %s2053_s24 = smov (%p629_p11), %s2052_s22  ;;  %s2054_s0 = sand.u32 (%p629_p11), 1, %s1641_s28  }
 0x175   : >> { %1423 = vmatpush3.bf16.msra.mxu0 %v1556_v28  ;;  %s1241_s26 = scalar_lea.sflag (%p629_p11), [#allocation3], %s2054_s0  ;;  %s1579_s19 = scalar_lea.vmem (%p629_p11), %s1964_s23, 128 }
 0x176   : >> { %1436 = vmatprep.subr.bf16.mxu0 %v1659_v24  ;;  %p1580_p12 = scmp.ne.s32.totalorder (%p629_p11), %s1964_s23, %s1579_s19  ;;  %s1663_s20 = smov (%p629_p11), [#allocation2]  }
 0x177   : > { %s1583_s21 = sshll.u32 (%p629_p11), %s1663_s20, 4  ;;  %s1584_s21 = int_to_ptr.vmem [resolvable:$false] %s1583_s21 }
 0x178   : >> { %1425 = vmatmul.mubr.msk.bf16.vlgmr.msra.gmra.mrb[0].mxu0 %vm590_vm0, %v1834_v22  ;;  %p1581_p13 = pnand (%p629_p11), %p1580_p12, %p1797_p5  ;;  %s1585_s27 = scalar_lea.vmem (%p629_p11), %s1584_s21, 256 }
 0x179   : >> { %1440 = vmatprep.mubr.msk.bf16.mxu0 %vm1660_vm3, %v1659_v24  ;;  %1437 = vmatpush3.bf16.msra.mxu0 %v1557_v44  ;;  %p1586_p1 = scmp.lt.s32.totalorder (%p629_p11), %s1964_s23, %s1584_s21  ;;  %p1587_p2 = scmp.lt.s32.totalorder (%p629_p11), %s1585_s27, %s1579_s19 }
 0x17a   : >> { %1438 = vmatprep.subr.bf16.mxu0 %v1659_v24  ;;  %p1582_p0 = pneg (%p629_p11), %p1581_p13 }
 0x17b   : > { %p1588_p3 = por (%p629_p11), %p1587_p2, %p1586_p1 }
 0x17d   : >> { %1439 = vmatpush3.bf16.msra.mxu0 %v1558_v45  ;;  %p1589_p4 = pnand (%p629_p11), %p1588_p3, %p1582_p0 }
 0x17e   : >> { %1450 = vmatprep.subr.bf16.mxu0 %v1659_v24 }
 0x180   : >> { %1441 = vmatmul.mubr.msk.bf16.vlgmr.msra.gmra.mrb[4].mxu0 %vm590_vm0, %v1834_v22  ;;  %v1564_v22 = vld [vmem:[%s2021_s12 + $0x8] sm:$0xff] (%p629_p11)  }
 0x181   : >> { %1452 = vmatprep.mubr.msk.bf16.mxu0 %vm1660_vm3, %v1659_v24 }
 0x246   : >> { %v765_v30 = vpop.f32.mrb[0].mxu1 }
 0x247   : >> { %v766_v31 = vadd.f32 %v1356_v29, %v765_v30  ;;  %v1434_v32 = vpop.f32.mrb[1].mxu1  ;;  %v1565_v30 = vld [vmem:[%s2023_s14] sm:$0xff] (%p629_p11)  }
 0x248   : >> { %v768_v33 = vpop.f32.mrb[2].mxu1 }
 0x249   : >> { %v771_v36 = vpack.c.bf16 %v766_v31, %v766_v31  ;;  %v1435_v37 = vpop.f32.mrb[3].mxu1 }
 0x24b   : >> { %v698_v35 = vpop.f32.mrb[0].mxu0  ;;  %v844_v40 = vsel %vm839_vm4, %v771_v36, 0 }
 0x24c   : >> { %v1426_v38 = vpop.f32.mrb[1].mxu0  ;;  %v699_v41 = vadd.f32 %v1351_v34, %v698_v35  ;;  %1445 = vmatpush3.bf16.xpose.msra.mxu1 %v844_v40 }
 0x24d   : >> { %v701_v39 = vpop.f32.mrb[2].mxu0  ;;  %1456 = vmatprep.subr.bf16.mxu1 %v1659_v24 }
 0x24e   : >> { %v1427_v42 = vpop.f32.mrb[3].mxu0  ;;  %v704_v43 = vpack.c.bf16 %v699_v41, %v699_v41  ;;  %v1371_v39 = vld [vmem:[%s2025_s16] ss:$0 sm:$0xff] (%p629_p11) }
 0x24f   : > { %v1372_v42 = vld [vmem:[%s2026_s17] ss:$0 sm:$0xff] (%p629_p11) }
 0x253   : >> { %1447 = vmatmul.mubr.msk.bf16.vlgmr.msra.gmra.mrb[4].mxu1 %vm839_vm4, %v704_v43  ;;  %v832_v58 = vpop.f32.mrb[4].mxu0 }
 0x254   : >> { %1458 = vmatprep.mubr.msk.bf16.mxu1 %vm1660_vm3, %v1659_v24  ;;  %v1442_v59 = vpop.f32.mrb[5].mxu0  ;;  %v833_v63 = vadd.f32 %v1361_v61, %v832_v58  ;;  %1457 = vmatpush3.bf16.msra.mxu1 %v961_v5 }
 0x255   : >> { %v835_v60 = vpop.f32.mrb[6].mxu0 }
 0x256   : >> { %v1443_v62 = vpop.f32.mrb[7].mxu0  ;;  %v838_v2 = vpack.c.bf16 %v833_v63, %v833_v63 }
 0x258   : >> { %v911_v3 = vsel %vm909_vm5, %v838_v2, 0 }
 0x259   : >> { %1451 = vmatpush3.bf16.msra.mxu0 %v911_v3 }
 0x326   : >> { %v880_v46 = vpop.f32.mrb[4].mxu1 }
 0x327   : >> { %v886_v47 = vmul.f32 0.35355338, %v880_v46  ;;  %v1448_v48 = vpop.f32.mrb[5].mxu1  ;;  %v1566_v46 = vld [vmem:[%s2023_s14 + $0x8] sm:$0xff] (%p629_p11)  }
 0x328   : >> { %v883_v49 = vpop.f32.mrb[6].mxu1  ;;  %v1568_v48 = vld [vmem:[%s2023_s14 + $0x18] sm:$0xff] (%p629_p11)  }
 0x329   : >> { %v893_v50 = vadd.f32 %v1815_v0, %v886_v47  ;;  %v1449_v51 = vpop.f32.mrb[7].mxu1  ;;  %v1563_v0 = vld [vmem:[%s2021_s12] sm:$0xff] (%p629_p11)   ;;  %v1567_v47 = vld [vmem:[%s2023_s14 + $0x10] sm:$0xff] (%p629_p11)  }
 0x32a   : > { %v1569_v49 = vld [vmem:[%s2023_s14 + $0x20] sm:$0xff] (%p629_p11)   ;;  %v1571_v51 = vld [vmem:[%s2023_s14 + $0x30] sm:$0xff] (%p629_p11)  }
 0x32b   : >> { %v894_v52 = vsel %vm839_vm4, %v893_v50, -inf }
 0x32c   : >> { %895 = vmax.xlane.f32.xlu0 %v894_v52  ;;  %v1572_v52 = vld [vmem:[%s2023_s14 + $0x38] sm:$0xff] (%p629_p11)  }
 0x3b9   : >> { %v896_v53 = vpop.xlane.xlu0 %895 }
 0x3ba   : >> { %v897_v54 = vsub.f32 %v893_v50, %v896_v53  ;;  %v1570_v50 = vld [vmem:[%s2023_s14 + $0x28] sm:$0xff] (%p629_p11)   ;;  %v1373_v53 = vld [vmem:[%s2022_s13] ss:$0 sm:$0xff] (%p629_p11) }
 0x3bc   : >> { %v898_v55 = vmul.f32 1.442695, %v897_v54 }
 0x3be   : >> { %1559 = vpow2.f32 %v898_v55 }
 0x3c8   : >> { %v1560_v56 = vpop.eup %1559 }
 0x3c9   : >> { %v900_v57 = vsel %vm839_vm4, %v1560_v56, 0.0 }
 0x3ca   : >> { %901 = vadd.xlane.f32.xlu0 %v900_v57 }
 0x457   : >> { %v902_v6 = vpop.xlane.xlu0 %901 }
 0x458   : >> { %1561 = vrcp.f32 %v902_v6 }
 0x462   : >> { %v1562_v7 = vpop.eup %1561 }
 0x463   : >> { %v904_v8 = vmul.f32 %v1562_v7, %v1560_v56 }
 0x465   : >> { %v905_v9 = vpack.c.bf16 %v904_v8, %v904_v8  ;;  %v1385_v8 = vld [vmem:[%s2024_s15] ss:$0 sm:$0xff] (%p629_p11) }
 0x467   : >> { %1453 = vmatmul.mubr.msk.bf16.vlgmr.msra.gmra.mrb[8].mxu0 %vm839_vm4, %v905_v9 }
 0x53a   : >> { %v947_v10 = vpop.f32.mrb[8].mxu0 }
 0x53b   : >> { %v953_v11 = vpack.c.bf16 %v947_v10, %v947_v10  ;;  %v1454_v12 = vpop.f32.mrb[9].mxu0 }
 0x53c   : >> { %v950_v13 = vpop.f32.mrb[10].mxu0 }
 0x53d   : >> { %v1455_v14 = vpop.f32.mrb[11].mxu0  ;;  %1459 = vmatmul.mubr.msk.bf16.vlgmr.msra.gmra.mrb[8].mxu1 %vm839_vm4, %v953_v11 }
 0x60d   : > { %631 = sbr.rel (!%p629_p11) target bundleno = 361 (0x169), region = 144 }
 0x610   : >> { %v997_v15 = vpop.f32.mrb[8].mxu1 }
 0x611   : >> { %v1003_v16 = vadd.f32 %v1653_v23, %v997_v15   ;;  %v1460_v17 = vpop.f32.mrb[9].mxu1 }
 0x612   : >> { %v1000_v18 = vpop.f32.mrb[10].mxu1 }
 0x613   : >> { %v1461_v19 = vpop.f32.mrb[11].mxu1  ;;  %v2051_v23 = vmov %v1003_v16  ;;  %v1004_v20 = vadd.f32 (%p629_p11), %v1003_v16, %v1817_v1  ;;  %v1661_v1 = vmov (%p629_p11), 0.0  }
 0x614   : > { %1462 = vmatprep.subr.bf16.mxu0 %v1661_v1  ;;  %1466 = vmatprep.mubr.msk.bf16.mxu0 %vm1662_vm6, %v1661_v1 }
 0x615   : > { %v1906_v24 = vadd.f32 %v1370_v21, %v1004_v20  ;;  %1463 = vmatpush3.bf16.msra.mxu0 %v1563_v0  ;;  %1470 = vmatprep.subr.bf16.mxu1 %v1661_v1 }
 0x616   : > { %1464 = vmatprep.subr.bf16.mxu0 %v1661_v1  ;;  %1486 = vmatprep.mubr.msk.bf16.mxu1 %vm1662_vm6, %v1661_v1 }
 0x617   : > { %v1015_v23 = vsel %vm590_vm0, %v1906_v24, 0.0  ;;  %1471 = vmatpush3.bf16.msra.mxu1 %v1565_v30 }
 0x618   : > { %1016 = vadd.xlane.f32.xlu0 %v1015_v23  ;;  %1472 = vmatprep.subr.bf16.mxu1 %v1661_v1 }
 0x619   : > { %1465 = vmatpush3.bf16.msra.mxu0 %v1564_v22 }
 0x61b   : > { %1473 = vmatpush3.bf16.msra.mxu1 %v1566_v46 }
 0x61c   : > { %1474 = vmatprep.subr.bf16.mxu1 %v1661_v1 }
 0x61f   : > { %1475 = vmatpush3.bf16.msra.mxu1 %v1567_v47 }
 0x620   : > { %1476 = vmatprep.subr.bf16.mxu1 %v1661_v1 }
 0x623   : > { %1477 = vmatpush3.bf16.msra.mxu1 %v1568_v48 }
 0x624   : > { %1478 = vmatprep.subr.bf16.mxu1 %v1661_v1 }
 0x627   : > { %1479 = vmatpush3.bf16.msra.mxu1 %v1569_v49 }
 0x628   : > { %1480 = vmatprep.subr.bf16.mxu1 %v1661_v1 }
 0x62b   : > { %1481 = vmatpush3.bf16.msra.mxu1 %v1570_v50 }
 0x62c   : > { %1482 = vmatprep.subr.bf16.mxu1 %v1661_v1 }
 0x62f   : > { %1483 = vmatpush3.bf16.msra.mxu1 %v1571_v51 }
 0x630   : > { %1484 = vmatprep.subr.bf16.mxu1 %v1661_v1 }
 0x633   : > { %1485 = vmatpush3.bf16.msra.mxu1 %v1572_v52 }
 0x6a5   : > { %v1017_v25 = vpop.xlane.xlu0 %1016 }
 0x6a6   : > { %v1018_v26 = vmul.f32 0.03125, %v1017_v25 }
 0x6a8   : > { %v1019_v27 = vsub.f32 %v1906_v24, %v1018_v26 }
 0x6aa   : > { %v1020_v28 = vmul.f32 %v1019_v27, %v1019_v27  ;;  %v1031_v40 = vmul.f32 %v1371_v39, %v1019_v27 }
 0x6ac   : > { %v1021_v29 = vsel %vm590_vm0, %v1020_v28, 0.0 }
 0x6ad   : > { %1022 = vadd.xlane.f32.xlu0 %v1021_v29 }
 0x73a   : > { %v1023_v31 = vpop.xlane.xlu0 %1022 }
 0x73b   : > { %v1024_v32 = vmul.f32 0.03125, %v1023_v31 }
 0x73d   : > { %1573 = vrsqrt.f32 %v1024_v32  ;;  %vm1034_vm7 = vcmp.eq.f32.partialorder %v1024_v32, inf  ;;  %v1037_v35 = vand.u32 2147483648, %v1024_v32  ;;  %vm1036_vm8 = vcmp.eq.f32.partialorder %v1024_v32, 0.0 }
 0x747   : > { %v1574_v33 = vpop.eup %1573 }
 0x748   : > { %v1033_v34 = vmul.f32 %v1574_v33, %v1024_v32 }
 0x74a   : > { %v1035_v36 = vsel %vm1034_vm7, %v1024_v32, %v1033_v34 }
 0x74b   : > { %v1038_v37 = vsel %vm1036_vm8, %v1037_v35, %v1035_v36 }
 0x74c   : > { %v1039_v38 = vadd.f32 1e-06, %v1038_v37 }
 0x74e   : > { %1575 = vrcp.f32 %v1039_v38 }
 0x758   : > { %v1576_v41 = vpop.eup %1575 }
 0x759   : > { %v1041_v43 = vmul.f32 %v1576_v41, %v1031_v40 }
 0x75b   : > { %v1048_v44 = vadd.f32 %v1372_v42, %v1041_v43 }
 0x75d   : > { %v1049_v45 = vpack.c.bf16 %v1048_v44, %v1048_v44 }
 0x75f   : > { %1467 = vmatmul.mubr.msk.bf16.vlgmr.msra.gmra.mrb[0].mxu0 %vm590_vm0, %v1049_v45 }
 0x832   : > { %v1110_v54 = vpop.f32.mrb[0].mxu0 }
 0x833   : > { %v1111_v55 = vadd.f32 %v1373_v53, %v1110_v54  ;;  %v1468_v56 = vpop.f32.mrb[1].mxu0 }
 0x834   : > { %v1113_v57 = vpop.f32.mrb[2].mxu0 }
 0x835   : > { %v1117_v58 = vmul.f32 %v1111_v55, %v1111_v55  ;;  %v1469_v59 = vpop.f32.mrb[3].mxu0  ;;  %v1116_v3 = vmul.f32 0.5, %v1111_v55 }
 0x837   : > { %v1118_v60 = vmul.f32 %v1117_v58, %v1111_v55 }
 0x839   : > { %v1119_v61 = vmul.f32 0.044715, %v1118_v60 }
 0x83b   : > { %v1120_v62 = vadd.f32 %v1119_v61, %v1111_v55 }
 0x83d   : > { %v1121_v63 = vmul.f32 0.7978846, %v1120_v62 }
 0x83f   : > { %1577 = vtanh.f32 %v1121_v63 }
 0x849   : > { %v1578_v2 = vpop.eup %1577 }
 0x84a   : > { %v1123_v4 = vadd.f32 1.0, %v1578_v2 }
 0x84c   : > { %v1124_v5 = vmul.f32 %v1123_v4, %v1116_v3 }
 0x84e   : > { %v1125_v6 = vpack.c.bf16 %v1124_v5, %v1124_v5 }
 0x850   : > { %1487 = vmatmul.mubr.bf16.vlgmr.msra.gmra.mrb[0].mxu1 %v1125_v6 }
 0x923   : > { %v1224_v7 = vpop.f32.mrb[0].mxu1 }
 0x924   : > { %v1230_v9 = vadd.f32 %v1224_v7, %v1906_v24  ;;  %v1488_v10 = vpop.f32.mrb[1].mxu1 }
 0x925   : > { %v1227_v11 = vpop.f32.mrb[2].mxu1 }
 0x926   : > { %v1238_v12 = vadd.f32 %v1385_v8, %v1230_v9  ;;  %v1489_v13 = vpop.f32.mrb[3].mxu1 }
 0x928   : > { %1239 = vst.msk [vmem:[%s2053_s24] sm:$0xff] %vm590_vm0, %v1238_v12 }
 0x929   : > { %1592 = shalt.err (!%p1589_p4)
}
 0x92a   : > { %s1593_s29 = scalar_lea.hbm %s1962_s11, 128  ;;  %s1597_s25 = scalar_lea.hbm %s2027_s18, 256 }
 0x92b   : > { %p1594_p7 = scmp.ne.s32.totalorder %s1962_s11, %s1593_s29  ;;  %p1598_p10 = scmp.lt.u32.totalorder %s1962_s11, %s2027_s18 }
 0x92c   : > { %p1599_p11 = scmp.lt.u32.totalorder %s1597_s25, %s1593_s29  ;;  %p1601_p13 = scmp.lt.u32.totalorder %s1593_s29, %s1962_s11 }
 0x92d   : > { %p1595_p8 = pnand %p1594_p7, %p1797_p5 }
 0x92e   : > { %p1600_p12 = por %p1599_p11, %p1598_p10 }
 0x92f   : > { %p1596_p9 = pneg %p1595_p8 }
 0x930   : > { %p1602_p0 = por %p1601_p13, %p1600_p12 }
 0x932   : > { %p1603_p1 = pnand %p1602_p0, %p1596_p9 }
 0x934   : > { %1606 = shalt.err (!%p1603_p1)
}
 0x935   : > { %1490 = dma.vmem_to_hbm [thread:$0]  (%p1797_p5), %s1964_s23, 128, %s1962_s11, %s1241_s26  }
 0x936 PF: > { %s2055_s0 = sld [smem:[#allocation5_spill]]  ;;  %p1496_p2 = scmp.ge.s32.totalorder %s1649_s30, 2 }
 0x938   : > { %p1493_p3 = pnand %p1496_p2, %p1801_p6 }
 0x93c   : > { %s1266_s20 = sand.u32 1, %s2055_s0  }
 0x93d   : > { %s1267_s21 = scalar_lea.sflag [#allocation3], %s1266_s20 }
 0x93e   : > { %1632 = dma.done.wait (!%p1493_p3), %s1267_s21, 128  }
 0x93f   : > { %1634 = vsyncadd (!%p1493_p3), %s1267_s21, 4294967168  ;;  %s2057_s30 = sld [smem:[#allocation7_spill]]  ;;  %s2058_s29 = sld [smem:[#allocation6_spill]] }
 0x940   : > { %s2059_s1 = sld [smem:[#allocation8_spill]]  ;;  %s2060_s27 = smov %s1641_s28 }
 0x945   : > { %p28_p4 = scmp.ge.s32.totalorder %s2057_s30, 4   ;;  %s2061_s28 = smov %s2058_s29 }
 0x946   : > { %s2062_s29 = smov %s2059_s1 }
 0x947   :  { %30 = sbr.rel (!%p28_p4) target bundleno = 9 (0x9), region = 155 }
 0x94e   :  { %1272 = vsyncpa [#allocation3], 1 }
 0x94f   :  { %1274 = vsyncpa [#allocation3 + $0x1], 1 }

</bundles_post_ra>
